<compile_context>
chip_gen: v7x
topology: tpu7x:2x2x1
jax: 0.10.0
libtpu: 0.0.40
codegen_flags: <defaults>
</compile_context>

<pallas_src>
import functools

import jax
import jax.numpy as jnp
from jax import lax
from jax.experimental import pallas as pl
from jax.experimental.pallas import tpu as pltpu

EPS = 1e-8


def _round_up(x, m):
    return (x + m - 1) // m * m


def _vmem_limit_bytes():
    """Explicit VMEM budget with headroom below the chip's physical capacity."""
    try:
        cap = int(pltpu.get_tpu_info().vmem_capacity_bytes)
        if cap > 0:
            return min((cap * 3) // 4, 100 * 1024 * 1024)
    except Exception:
        pass
    return 48 * 1024 * 1024  # safe on every generation (v7x physical = 64 MiB)


# ------------------------------ Pallas kernel -------------------------------

def _c1d_kernel(a_ref, x_ref, w11_ref, hp_ref, wd_ref, wrs_ref, brs_ref,
                res_ref, skip_ref, *, dilation, padding, t_in, t_out,
                hidden_dim, depth_kernel, sep_dim):
    """Fused C1D block for one batch sample.

    a_ref   : SMEM (2,) f32    [prelu1_alpha, prelu2_alpha]
    x_ref   : (S, T)   bf16    input sample (unpadded time axis)
    w11_ref : (H, S)   bf16    conv11 weight
    hp_ref  : (H, 6)   f32     packed [b11, gamma1, beta1, bias_d, gamma2, beta2]
    wd_ref  : (KD,H,H) bf16    dilated-conv weight, tap-major
    wrs_ref : (2S, H)  bf16    [res_out weight ; skip_out weight]
    brs_ref : (2S, 1)  f32     [res_out bias   ; skip_out bias]
    res_ref : (S, Tp)  bf16    valid lanes [0, t_out), rest zero
    skip_ref: (S, Tp)  bf16    valid lanes [0, t_out), rest zero
    """
    H = hidden_dim
    S = sep_dim
    KD = depth_kernel
    Tp = res_ref.shape[-1]

    col = lax.broadcasted_iota(jnp.int32, (1, Tp), 1)
    mask_in = (col < t_in).astype(jnp.float32)
    mask_out = (col < t_out).astype(jnp.float32)

    a1 = a_ref[0]
    a2 = a_ref[1]
    b11, g1, bt1 = hp_ref[:, 0:1], hp_ref[:, 1:2], hp_ref[:, 2:3]
    bd, g2, bt2 = hp_ref[:, 3:4], hp_ref[:, 4:5], hp_ref[:, 5:6]

    # --- zero-extend x from T to Tp lanes in-register (small: S x (Tp - T)),
    #     then conv11 (1x1, S -> H): bf16 inputs, f32 accumulation.
    x = x_ref[...].astype(jnp.float32)                         # (S, T)
    if Tp > t_in:
        x = jnp.concatenate(
            [x, jnp.zeros((S, Tp - t_in), jnp.float32)], axis=1)
    y = jnp.dot(w11_ref[...], x.astype(jnp.bfloat16),
                preferred_element_type=jnp.float32) + b11
    y = jnp.where(y > 0, y, a1 * y)                            # PReLU1

    # --- GroupNorm(1, H) #1: single-pass masked statistics (f32 accumulation).
    n1 = float(H * t_in)
    ym = y * mask_in
    s1 = jnp.sum(ym)
    s2 = jnp.sum(ym * ym)
    mu1 = s1 / n1
    var1 = s2 / n1 - mu1 * mu1
    # mask z so lanes >= t_in behave as the dilated conv's zero padding below.
    z = ((y - mu1) * lax.rsqrt(var1 + EPS) * g1 + bt1) * mask_in

    # --- dilated conv (kernel = KD) as per-tap roll + matmul accumulation.
    #     out[:, j] = sum_k W_k @ z[:, j + k*d - p]  (zero outside [0, t_in)).
    #     Because Tp >= t_in + padding, each roll's circular wrap only brings
    #     data into (a) columns where z is already zero or (b) output columns
    #     >= t_out, which are excluded from GN2 stats and zeroed at the end.
    y2 = None
    for k in range(KD):
        shift = k * dilation - padding
        if shift == 0:
            zk = z
        else:
            zk = pltpu.roll(z, (-shift) % Tp, 1)               # XLU rotation
        d = jnp.dot(wd_ref[k], zk.astype(jnp.bfloat16),
                    preferred_element_type=jnp.float32)
        y2 = d if y2 is None else y2 + d
    y2 = y2 + bd
    y2 = jnp.where(y2 > 0, y2, a2 * y2)                        # PReLU2

    # --- GroupNorm(1, H) #2: single-pass masked statistics.
    n2 = float(H * t_out)
    y2m = y2 * mask_out
    t1 = jnp.sum(y2m)
    t2 = jnp.sum(y2m * y2m)
    mu2 = t1 / n2
    var2 = t2 / n2 - mu2 * mu2
    yn2 = (y2 - mu2) * lax.rsqrt(var2 + EPS) * g2 + bt2

    # --- res_out and skip_out fused into one stacked 1x1-conv matmul; padded
    #     output columns (>= t_out) are zeroed so downstream can consume the
    #     lane-dense tensors directly.
    out = jnp.dot(wrs_ref[...], yn2.astype(jnp.bfloat16),
                  preferred_element_type=jnp.float32) + brs_ref[...]
    out = out * mask_out
    res_ref[...] = out[:S].astype(res_ref.dtype)
    skip_ref[...] = out[S:].astype(skip_ref.dtype)


# ----------------------------- parameter setup ------------------------------

def init_params(key, *, sep_dim, hidden_dim, depth_conv_kernel=3):
    def nrm(k, shape, scale):
        return scale * jax.random.normal(k, shape, jnp.float32)

    ks = iter(jax.random.split(key, 16))
    p = {}
    p['w11'] = nrm(next(ks), (hidden_dim, sep_dim), 0.2)
    p['b11'] = nrm(next(ks), (hidden_dim,), 0.05)
    p['a1'] = jnp.float32(0.25)                       # PReLU default init
    p['g1'] = 1.0 + nrm(next(ks), (hidden_dim,), 0.1)
    p['bt1'] = nrm(next(ks), (hidden_dim,), 0.1)
    p['wd'] = nrm(next(ks), (hidden_dim, hidden_dim, depth_conv_kernel), 0.15)
    p['bd'] = nrm(next(ks), (hidden_dim,), 0.05)
    p['a2'] = jnp.float32(0.25)
    p['g2'] = 1.0 + nrm(next(ks), (hidden_dim,), 0.1)
    p['bt2'] = nrm(next(ks), (hidden_dim,), 0.1)
    p['wr'] = nrm(next(ks), (sep_dim, hidden_dim), 0.2)
    p['br'] = nrm(next(ks), (sep_dim,), 0.05)
    p['ws'] = nrm(next(ks), (sep_dim, hidden_dim), 0.2)
    p['bs'] = nrm(next(ks), (sep_dim,), 0.05)
    return p


def _pack_params(p):
    """Pack parameters into fused-kernel layouts (done once, tiny tensors).

    Matmul weights are stored bf16 (halves their DMA / VMEM); per-channel
    vectors and biases stay f32 since they feed elementwise f32 math.
    """
    hp = jnp.stack([p['b11'], p['g1'], p['bt1'],
                    p['bd'], p['g2'], p['bt2']], axis=1).astype(jnp.float32)
    w11 = p['w11'].astype(jnp.bfloat16)                              # (H, S)
    wd = jnp.transpose(p['wd'], (2, 0, 1)).astype(jnp.bfloat16)      # (KD,H,H)
    wrs = jnp.concatenate([p['wr'], p['ws']], axis=0).astype(jnp.bfloat16)
    brs = jnp.concatenate([p['br'], p['bs']],
                          axis=0)[:, None].astype(jnp.float32)       # (2S, 1)
    alphas = jnp.stack([p['a1'], p['a2']]).astype(jnp.float32)       # SMEM (2,)
    return alphas, w11, hp, wd, wrs, brs


# ------------------------------- forward pass -------------------------------

def c1d_forward(x, params, *, dilation, padding):
    """Pallas forward of the C1D block.

    x: (B, sep_dim, T) -> (res, skip, t_out) where res/skip are bf16
    (B, sep_dim, Tp) with Tp a multiple of 128 and columns >= t_out zeroed.
    A TCN stack can consume the padded tensors directly; slice to t_out once
    downstream if the exact PyTorch shape is needed.
    """
    B, S, T = x.shape
    H, _, KD = params['wd'].shape
    t_out = T + 2 * padding - dilation * (KD - 1)
    assert t_out > 0, "dilated conv output would be empty"
    # Tp >= max(t_out, T + padding): lane-dense AND makes every per-tap roll's
    # wrap-around land only on zero z columns or output columns >= t_out.
    Tp = _round_up(max(t_out, T + padding), 128)

    alphas, w11, hp, wd, wrs, brs = _pack_params(params)
    x_bf = x.astype(jnp.bfloat16)          # bf16 HBM I/O (halves the DMA)

    kernel = functools.partial(
        _c1d_kernel, dilation=dilation, padding=padding,
        t_in=T, t_out=t_out, hidden_dim=H, depth_kernel=KD, sep_dim=S)

    res, skip = pl.pallas_call(
        kernel,
        out_shape=(jax.ShapeDtypeStruct((B, S, Tp), jnp.bfloat16),
                   jax.ShapeDtypeStruct((B, S, Tp), jnp.bfloat16)),
        grid=(B,),
        in_specs=[
            pl.BlockSpec(memory_space=pltpu.MemorySpace.SMEM),   # PReLU alphas
            pl.BlockSpec((None, S, T), lambda b: (b, 0, 0)),     # x (per sample)
            pl.BlockSpec((H, S), lambda b: (0, 0)),              # w11 (bf16)
            pl.BlockSpec((H, 6), lambda b: (0, 0)),              # packed chans
            pl.BlockSpec((KD, H, H), lambda b: (0, 0, 0)),       # wd tap-major
            pl.BlockSpec((2 * S, H), lambda b: (0, 0)),          # wr|ws stacked
            pl.BlockSpec((2 * S, 1), lambda b: (0, 0)),          # br|bs stacked
        ],
        out_specs=(pl.BlockSpec((None, S, Tp), lambda b: (b, 0, 0)),
                   pl.BlockSpec((None, S, Tp), lambda b: (b, 0, 0))),
        compiler_params=pltpu.CompilerParams(
            dimension_semantics=("parallel",),
            vmem_limit_bytes=_vmem_limit_bytes()),
    )(alphas, x_bf, w11, hp, wd, wrs, brs)

    return res, skip, t_out


# --------------------------- pure-JAX reference ------------------------------

def c1d_reference(x, p, *, dilation, padding):
    hi = lax.Precision.HIGHEST

    def prelu(v, a):
        return jnp.where(v > 0, v, a * v)

    def gn(v, g, b):
        mu = jnp.mean(v, axis=(1, 2), keepdims=True)
        var = jnp.mean(jnp.square(v - mu), axis=(1, 2), keepdims=True)
        return ((v - mu) / jnp.sqrt(var + EPS) * g[None, :, None]
                + b[None, :, None])

    x = x.astype(jnp.float32)
    y = jnp.einsum('hs,bst->bht', p['w11'], x,
                   precision=hi) + p['b11'][None, :, None]
    z = gn(prelu(y, p['a1']), p['g1'], p['bt1'])
    dn = ('NCH', 'OIH', 'NCH')
    y2 = lax.conv_general_dilated(z, p['wd'], (1,), [(padding, padding)],
                                  rhs_dilation=(dilation,),
                                  dimension_numbers=dn, precision=hi)
    y2 = y2 + p['bd'][None, :, None]
    yn2 = gn(prelu(y2, p['a2']), p['g2'], p['bt2'])
    res = jnp.einsum('sh,bht->bst', p['wr'], yn2,
                     precision=hi) + p['br'][None, :, None]
    skip = jnp.einsum('sh,bht->bst', p['ws'], yn2,
                      precision=hi) + p['bs'][None, :, None]
    return res, skip


# ----------------------------------- main ------------------------------------

if __name__ == "__main__":
    B, SEP_DIM, HIDDEN_DIM, T = 2, 16, 32, 64
    DEPTH_CONV_KERNEL = 3

    key = jax.random.PRNGKey(0)
    kx, kp = jax.random.split(key)
    x = jax.random.normal(kx, (B, SEP_DIM, T), jnp.float32)
    params = init_params(kp, sep_dim=SEP_DIM, hidden_dim=HIDDEN_DIM,
                         depth_conv_kernel=DEPTH_CONV_KERNEL)

    # (dilation, padding) configs: the TasNet "same"-length ones plus one
    # asymmetric padding to exercise the general (roll / masking) path.
    configs = [(1, 1), (2, 2), (4, 4), (3, 2)]
    for d, pd in configs:
        res_p, skip_p, t_out = c1d_forward(x, params, dilation=d, padding=pd)
        res_p = jax.block_until_ready(res_p)
        skip_p = jax.block_until_ready(skip_p)

        # Padded lanes must be exactly zero (kernel masks them).
        assert bool(jnp.all(res_p[:, :, t_out:] == 0)), (d, pd)
        assert bool(jnp.all(skip_p[:, :, t_out:] == 0)), (d, pd)

        # Test-only downstream slice to the exact conv output length.
        res = res_p[:, :, :t_out].astype(jnp.float32)
        skip = skip_p[:, :, :t_out].astype(jnp.float32)

        r_ref, s_ref = c1d_reference(x, params, dilation=d, padding=pd)
        assert res.shape == r_ref.shape, (res.shape, r_ref.shape)
        assert skip.shape == s_ref.shape, (skip.shape, s_ref.shape)
        # bf16 dot inputs + bf16 outputs vs f32-highest reference.
        assert jnp.allclose(res, r_ref, atol=8e-2, rtol=8e-2), (
            d, pd, float(jnp.max(jnp.abs(res - r_ref))))
        assert jnp.allclose(skip, s_ref, atol=8e-2, rtol=8e-2), (
            d, pd, float(jnp.max(jnp.abs(skip - s_ref))))

    print("KERNEL_OK")
</pallas_src>

<mosaic_0001>
module attributes {stable_mosaic.version = 11 : i64} {
  func.func @_c1d_kernel(%arg0: i32, %arg1: memref<2xf32, #tpu.memory_space<smem>>, %arg2: memref<1x16x64xbf16, #tpu.memory_space<vmem>>, %arg3: memref<32x16xbf16, #tpu.memory_space<vmem>>, %arg4: memref<32x6xf32, #tpu.memory_space<vmem>>, %arg5: memref<3x32x32xbf16, #tpu.memory_space<vmem>>, %arg6: memref<32x32xbf16, #tpu.memory_space<vmem>>, %arg7: memref<32x1xf32, #tpu.memory_space<vmem>>, %arg8: memref<1x16x128xbf16, #tpu.memory_space<vmem>>, %arg9: memref<1x16x128xbf16, #tpu.memory_space<vmem>>) attributes {dimension_semantics = [#tpu.dimension_semantics<parallel>], iteration_bounds = array<i64: 2>, scalar_prefetch = 0 : i64, scratch_operands = 0 : i64, tpu.core_type = #tpu.core_type<tc>, window_params = [{transform_indices = @transform_0, window_bounds = array<i64: 2>}, {transform_indices = @transform_1, window_bounds = array<i64: 1, 16, 64>}, {pipeline_mode = #tpu.pipeline_mode<synchronous>, transform_indices = @transform_2, window_bounds = array<i64: 32, 16>}, {pipeline_mode = #tpu.pipeline_mode<synchronous>, transform_indices = @transform_3, window_bounds = array<i64: 32, 6>}, {pipeline_mode = #tpu.pipeline_mode<synchronous>, transform_indices = @transform_4, window_bounds = array<i64: 3, 32, 32>}, {pipeline_mode = #tpu.pipeline_mode<synchronous>, transform_indices = @transform_5, window_bounds = array<i64: 32, 32>}, {pipeline_mode = #tpu.pipeline_mode<synchronous>, transform_indices = @transform_6, window_bounds = array<i64: 32, 1>}, {transform_indices = @transform_7, window_bounds = array<i64: 1, 16, 128>}, {transform_indices = @transform_8, window_bounds = array<i64: 1, 16, 128>}]} {
    %0 = tpu.iota {dimensions = array<i32: 1>} : vector<1x128xi32>
    %c64_i32 = arith.constant 64 : i32
    %1 = vector.broadcast %c64_i32 : i32 to vector<1x128xi32>
    %2 = arith.cmpi slt, %0, %1 : vector<1x128xi32>
    %3 = arith.extui %2 : vector<1x128xi1> to vector<1x128xi32>
    %4 = arith.sitofp %3 : vector<1x128xi32> to vector<1x128xf32>
    %c64_i32_0 = arith.constant 64 : i32
    %5 = vector.broadcast %c64_i32_0 : i32 to vector<1x128xi32>
    %6 = arith.cmpi slt, %0, %5 : vector<1x128xi32>
    %7 = arith.extui %6 : vector<1x128xi1> to vector<1x128xi32>
    %8 = arith.sitofp %7 : vector<1x128xi32> to vector<1x128xf32>
    %c0 = arith.constant 0 : index
    %9 = memref.load %arg1[%c0] : memref<2xf32, #tpu.memory_space<smem>>
    %c1 = arith.constant 1 : index
    %10 = memref.load %arg1[%c1] : memref<2xf32, #tpu.memory_space<smem>>
    %c0_1 = arith.constant 0 : index
    %c0_2 = arith.constant 0 : index
    %11 = vector.load %arg4[%c0_1, %c0_2] : memref<32x6xf32, #tpu.memory_space<vmem>>, vector<32x1xf32>
    %c0_3 = arith.constant 0 : index
    %c1_4 = arith.constant 1 : index
    %12 = vector.load %arg4[%c0_3, %c1_4] : memref<32x6xf32, #tpu.memory_space<vmem>>, vector<32x1xf32>
    %c0_5 = arith.constant 0 : index
    %c2 = arith.constant 2 : index
    %13 = vector.load %arg4[%c0_5, %c2] : memref<32x6xf32, #tpu.memory_space<vmem>>, vector<32x1xf32>
    %c0_6 = arith.constant 0 : index
    %c3 = arith.constant 3 : index
    %14 = vector.load %arg4[%c0_6, %c3] : memref<32x6xf32, #tpu.memory_space<vmem>>, vector<32x1xf32>
    %c0_7 = arith.constant 0 : index
    %c4 = arith.constant 4 : index
    %15 = vector.load %arg4[%c0_7, %c4] : memref<32x6xf32, #tpu.memory_space<vmem>>, vector<32x1xf32>
    %c0_8 = arith.constant 0 : index
    %c5 = arith.constant 5 : index
    %16 = vector.load %arg4[%c0_8, %c5] : memref<32x6xf32, #tpu.memory_space<vmem>>, vector<32x1xf32>
    %c0_9 = arith.constant 0 : index
    %c0_10 = arith.constant 0 : index
    %c0_11 = arith.constant 0 : index
    %17 = vector.load %arg2[%c0_9, %c0_10, %c0_11] : memref<1x16x64xbf16, #tpu.memory_space<vmem>>, vector<1x16x64xbf16>
    %18 = vector.shape_cast %17 : vector<1x16x64xbf16> to vector<16x64xbf16>
    %19 = arith.extf %18 : vector<16x64xbf16> to vector<16x64xf32>
    %cst = arith.constant 0.000000e+00 : f32
    %20 = vector.broadcast %cst : f32 to vector<16x64xf32>
    %21 = tpu.concatenate %19, %20 in 1 : vector<16x64xf32>, vector<16x64xf32> -> vector<16x128xf32>
    %c0_12 = arith.constant 0 : index
    %c0_13 = arith.constant 0 : index
    %22 = vector.load %arg3[%c0_12, %c0_13] : memref<32x16xbf16, #tpu.memory_space<vmem>>, vector<32x16xbf16>
    %23 = arith.truncf %21 : vector<16x128xf32> to vector<16x128xbf16>
    %cst_14 = arith.constant dense<0.000000e+00> : vector<32x128xf32>
    %24 = tpu.matmul %22, %23, %cst_14 {dimension_numbers = #tpu.dot_dimension_numbers<[1], [0], [0], [1], [0, 0, 1, 1], [], []>} : vector<32x16xbf16>, vector<16x128xbf16>, vector<32x128xf32> -> vector<32x128xf32>
    %25 = vector.broadcast %11 : vector<32x1xf32> to vector<32x128xf32>
    %26 = arith.addf %24, %25 : vector<32x128xf32>
    %cst_15 = arith.constant 0.000000e+00 : f32
    %27 = vector.broadcast %cst_15 : f32 to vector<32x128xf32>
    %28 = arith.cmpf ogt, %26, %27 : vector<32x128xf32>
    %29 = vector.broadcast %9 : f32 to vector<32x128xf32>
    %30 = arith.mulf %29, %26 : vector<32x128xf32>
    %31 = arith.select %28, %26, %30 : vector<32x128xi1>, vector<32x128xf32>
    %32 = vector.broadcast %4 : vector<1x128xf32> to vector<32x128xf32>
    %33 = arith.mulf %31, %32 : vector<32x128xf32>
    %34 = vector.shape_cast %33 : vector<32x128xf32> to vector<1x32x128xf32>
    %cst_16 = arith.constant dense<0.000000e+00> : vector<1xf32>
    %35 = vector.multi_reduction <add>, %34, %cst_16 [1, 2] : vector<1x32x128xf32> to vector<1xf32>
    %36 = vector.shape_cast %35 : vector<1xf32> to vector<1x1x1xf32>
    %37 = vector.extract %36[0, 0, 0] : f32 from vector<1x1x1xf32>
    %38 = arith.mulf %33, %33 : vector<32x128xf32>
    %39 = vector.shape_cast %38 : vector<32x128xf32> to vector<1x32x128xf32>
    %cst_17 = arith.constant dense<0.000000e+00> : vector<1xf32>
    %40 = vector.multi_reduction <add>, %39, %cst_17 [1, 2] : vector<1x32x128xf32> to vector<1xf32>
    %41 = vector.shape_cast %40 : vector<1xf32> to vector<1x1x1xf32>
    %42 = vector.extract %41[0, 0, 0] : f32 from vector<1x1x1xf32>
    %cst_18 = arith.constant 2.048000e+03 : f32
    %43 = arith.divf %37, %cst_18 : f32
    %cst_19 = arith.constant 2.048000e+03 : f32
    %44 = arith.divf %42, %cst_19 : f32
    %45 = arith.mulf %43, %43 : f32
    %46 = arith.subf %44, %45 : f32
    %47 = vector.broadcast %43 : f32 to vector<32x128xf32>
    %48 = arith.subf %31, %47 : vector<32x128xf32>
    %cst_20 = arith.constant 9.99999993E-9 : f32
    %49 = arith.addf %46, %cst_20 : f32
    %50 = math.rsqrt %49 : f32
    %51 = vector.broadcast %50 : f32 to vector<32x128xf32>
    %52 = arith.mulf %48, %51 : vector<32x128xf32>
    %53 = vector.broadcast %12 : vector<32x1xf32> to vector<32x128xf32>
    %54 = arith.mulf %52, %53 : vector<32x128xf32>
    %55 = vector.broadcast %13 : vector<32x1xf32> to vector<32x128xf32>
    %56 = arith.addf %54, %55 : vector<32x128xf32>
    %57 = vector.broadcast %4 : vector<1x128xf32> to vector<32x128xf32>
    %58 = arith.mulf %56, %57 : vector<32x128xf32>
    %c1_i32 = arith.constant 1 : i32
    %59 = tpu.dynamic_rotate %58 by %c1_i32 dim 1 : vector<32x128xf32>, i32 -> vector<32x128xf32>
    %c0_21 = arith.constant 0 : index
    %c0_22 = arith.constant 0 : index
    %c0_23 = arith.constant 0 : index
    %60 = vector.load %arg5[%c0_21, %c0_22, %c0_23] : memref<3x32x32xbf16, #tpu.memory_space<vmem>>, vector<1x32x32xbf16>
    %61 = vector.shape_cast %60 : vector<1x32x32xbf16> to vector<32x32xbf16>
    %62 = arith.truncf %59 : vector<32x128xf32> to vector<32x128xbf16>
    %cst_24 = arith.constant dense<0.000000e+00> : vector<32x128xf32>
    %63 = tpu.matmul %61, %62, %cst_24 {dimension_numbers = #tpu.dot_dimension_numbers<[1], [0], [0], [1], [0, 0, 1, 1], [], []>} : vector<32x32xbf16>, vector<32x128xbf16>, vector<32x128xf32> -> vector<32x128xf32>
    %c1_25 = arith.constant 1 : index
    %c0_26 = arith.constant 0 : index
    %c0_27 = arith.constant 0 : index
    %64 = vector.load %arg5[%c1_25, %c0_26, %c0_27] : memref<3x32x32xbf16, #tpu.memory_space<vmem>>, vector<1x32x32xbf16>
    %65 = vector.shape_cast %64 : vector<1x32x32xbf16> to vector<32x32xbf16>
    %66 = arith.truncf %58 : vector<32x128xf32> to vector<32x128xbf16>
    %cst_28 = arith.constant dense<0.000000e+00> : vector<32x128xf32>
    %67 = tpu.matmul %65, %66, %cst_28 {dimension_numbers = #tpu.dot_dimension_numbers<[1], [0], [0], [1], [0, 0, 1, 1], [], []>} : vector<32x32xbf16>, vector<32x128xbf16>, vector<32x128xf32> -> vector<32x128xf32>
    %68 = arith.addf %63, %67 : vector<32x128xf32>
    %c127_i32 = arith.constant 127 : i32
    %69 = tpu.dynamic_rotate %58 by %c127_i32 dim 1 : vector<32x128xf32>, i32 -> vector<32x128xf32>
    %c2_29 = arith.constant 2 : index
    %c0_30 = arith.constant 0 : index
    %c0_31 = arith.constant 0 : index
    %70 = vector.load %arg5[%c2_29, %c0_30, %c0_31] : memref<3x32x32xbf16, #tpu.memory_space<vmem>>, vector<1x32x32xbf16>
    %71 = vector.shape_cast %70 : vector<1x32x32xbf16> to vector<32x32xbf16>
    %72 = arith.truncf %69 : vector<32x128xf32> to vector<32x128xbf16>
    %cst_32 = arith.constant dense<0.000000e+00> : vector<32x128xf32>
    %73 = tpu.matmul %71, %72, %cst_32 {dimension_numbers = #tpu.dot_dimension_numbers<[1], [0], [0], [1], [0, 0, 1, 1], [], []>} : vector<32x32xbf16>, vector<32x128xbf16>, vector<32x128xf32> -> vector<32x128xf32>
    %74 = arith.addf %68, %73 : vector<32x128xf32>
    %75 = vector.broadcast %14 : vector<32x1xf32> to vector<32x128xf32>
    %76 = arith.addf %74, %75 : vector<32x128xf32>
    %cst_33 = arith.constant 0.000000e+00 : f32
    %77 = vector.broadcast %cst_33 : f32 to vector<32x128xf32>
    %78 = arith.cmpf ogt, %76, %77 : vector<32x128xf32>
    %79 = vector.broadcast %10 : f32 to vector<32x128xf32>
    %80 = arith.mulf %79, %76 : vector<32x128xf32>
    %81 = arith.select %78, %76, %80 : vector<32x128xi1>, vector<32x128xf32>
    %82 = vector.broadcast %8 : vector<1x128xf32> to vector<32x128xf32>
    %83 = arith.mulf %81, %82 : vector<32x128xf32>
    %84 = vector.shape_cast %83 : vector<32x128xf32> to vector<1x32x128xf32>
    %cst_34 = arith.constant dense<0.000000e+00> : vector<1xf32>
    %85 = vector.multi_reduction <add>, %84, %cst_34 [1, 2] : vector<1x32x128xf32> to vector<1xf32>
    %86 = vector.shape_cast %85 : vector<1xf32> to vector<1x1x1xf32>
    %87 = vector.extract %86[0, 0, 0] : f32 from vector<1x1x1xf32>
    %88 = arith.mulf %83, %83 : vector<32x128xf32>
    %89 = vector.shape_cast %88 : vector<32x128xf32> to vector<1x32x128xf32>
    %cst_35 = arith.constant dense<0.000000e+00> : vector<1xf32>
    %90 = vector.multi_reduction <add>, %89, %cst_35 [1, 2] : vector<1x32x128xf32> to vector<1xf32>
    %91 = vector.shape_cast %90 : vector<1xf32> to vector<1x1x1xf32>
    %92 = vector.extract %91[0, 0, 0] : f32 from vector<1x1x1xf32>
    %cst_36 = arith.constant 2.048000e+03 : f32
    %93 = arith.divf %87, %cst_36 : f32
    %cst_37 = arith.constant 2.048000e+03 : f32
    %94 = arith.divf %92, %cst_37 : f32
    %95 = arith.mulf %93, %93 : f32
    %96 = arith.subf %94, %95 : f32
    %97 = vector.broadcast %93 : f32 to vector<32x128xf32>
    %98 = arith.subf %81, %97 : vector<32x128xf32>
    %cst_38 = arith.constant 9.99999993E-9 : f32
    %99 = arith.addf %96, %cst_38 : f32
    %100 = math.rsqrt %99 : f32
    %101 = vector.broadcast %100 : f32 to vector<32x128xf32>
    %102 = arith.mulf %98, %101 : vector<32x128xf32>
    %103 = vector.broadcast %15 : vector<32x1xf32> to vector<32x128xf32>
    %104 = arith.mulf %102, %103 : vector<32x128xf32>
    %105 = vector.broadcast %16 : vector<32x1xf32> to vector<32x128xf32>
    %106 = arith.addf %104, %105 : vector<32x128xf32>
    %c0_39 = arith.constant 0 : index
    %c0_40 = arith.constant 0 : index
    %107 = vector.load %arg6[%c0_39, %c0_40] : memref<32x32xbf16, #tpu.memory_space<vmem>>, vector<32x32xbf16>
    %108 = arith.truncf %106 : vector<32x128xf32> to vector<32x128xbf16>
    %cst_41 = arith.constant dense<0.000000e+00> : vector<32x128xf32>
    %109 = tpu.matmul %107, %108, %cst_41 {dimension_numbers = #tpu.dot_dimension_numbers<[1], [0], [0], [1], [0, 0, 1, 1], [], []>} : vector<32x32xbf16>, vector<32x128xbf16>, vector<32x128xf32> -> vector<32x128xf32>
    %c0_42 = arith.constant 0 : index
    %c0_43 = arith.constant 0 : index
    %110 = vector.load %arg7[%c0_42, %c0_43] : memref<32x1xf32, #tpu.memory_space<vmem>>, vector<32x1xf32>
    %111 = vector.broadcast %110 : vector<32x1xf32> to vector<32x128xf32>
    %112 = arith.addf %109, %111 : vector<32x128xf32>
    %113 = vector.broadcast %8 : vector<1x128xf32> to vector<32x128xf32>
    %114 = arith.mulf %112, %113 : vector<32x128xf32>
    %115 = vector.extract_strided_slice %114 {offsets = [0, 0], sizes = [16, 128], strides = [1, 1]} : vector<32x128xf32> to vector<16x128xf32>
    %116 = arith.truncf %115 : vector<16x128xf32> to vector<16x128xbf16>
    %c0_44 = arith.constant 0 : index
    %c0_45 = arith.constant 0 : index
    %c0_46 = arith.constant 0 : index
    %117 = vector.load %arg8[%c0_44, %c0_45, %c0_46] : memref<1x16x128xbf16, #tpu.memory_space<vmem>>, vector<1x16x128xbf16>
    %118 = vector.shape_cast %117 : vector<1x16x128xbf16> to vector<16x128xbf16>
    %119 = vector.shape_cast %116 : vector<16x128xbf16> to vector<1x16x128xbf16>
    tpu.vector_store %arg8[%c0_44, %c0_45, %c0_46], %119 {strides = array<i32>} : memref<1x16x128xbf16, #tpu.memory_space<vmem>>, vector<1x16x128xbf16>,
    %120 = vector.extract_strided_slice %114 {offsets = [16, 0], sizes = [16, 128], strides = [1, 1]} : vector<32x128xf32> to vector<16x128xf32>
    %121 = arith.truncf %120 : vector<16x128xf32> to vector<16x128xbf16>
    %c0_47 = arith.constant 0 : index
    %c0_48 = arith.constant 0 : index
    %c0_49 = arith.constant 0 : index
    %122 = vector.load %arg9[%c0_47, %c0_48, %c0_49] : memref<1x16x128xbf16, #tpu.memory_space<vmem>>, vector<1x16x128xbf16>
    %123 = vector.shape_cast %122 : vector<1x16x128xbf16> to vector<16x128xbf16>
    %124 = vector.shape_cast %121 : vector<16x128xbf16> to vector<1x16x128xbf16>
    tpu.vector_store %arg9[%c0_47, %c0_48, %c0_49], %124 {strides = array<i32>} : memref<1x16x128xbf16, #tpu.memory_space<vmem>>, vector<1x16x128xbf16>,
    return
  }
  func.func @transform_0(%arg0: i32) -> i32 {
    %c0_i32 = arith.constant 0 : i32
    %c0_i32_0 = arith.constant 0 : i32
    return %c0_i32 : i32
  }
  func.func @transform_1(%arg0: i32) -> (i32, i32, i32) {
    %c0_i32 = arith.constant 0 : i32
    %c0_i32_0 = arith.constant 0 : i32
    %c0_i32_1 = arith.constant 0 : i32
    return %arg0, %c0_i32, %c0_i32_0 : i32, i32, i32
  }
  func.func @transform_2(%arg0: i32) -> (i32, i32) {
    %c0_i32 = arith.constant 0 : i32
    %c0_i32_0 = arith.constant 0 : i32
    %c0_i32_1 = arith.constant 0 : i32
    return %c0_i32, %c0_i32_0 : i32, i32
  }
  func.func @transform_3(%arg0: i32) -> (i32, i32) {
    %c0_i32 = arith.constant 0 : i32
    %c0_i32_0 = arith.constant 0 : i32
    %c0_i32_1 = arith.constant 0 : i32
    return %c0_i32, %c0_i32_0 : i32, i32
  }
  func.func @transform_4(%arg0: i32) -> (i32, i32, i32) {
    %c0_i32 = arith.constant 0 : i32
    %c0_i32_0 = arith.constant 0 : i32
    %c0_i32_1 = arith.constant 0 : i32
    %c0_i32_2 = arith.constant 0 : i32
    return %c0_i32, %c0_i32_0, %c0_i32_1 : i32, i32, i32
  }
  func.func @transform_5(%arg0: i32) -> (i32, i32) {
    %c0_i32 = arith.constant 0 : i32
    %c0_i32_0 = arith.constant 0 : i32
    %c0_i32_1 = arith.constant 0 : i32
    return %c0_i32, %c0_i32_0 : i32, i32
  }
  func.func @transform_6(%arg0: i32) -> (i32, i32) {
    %c0_i32 = arith.constant 0 : i32
    %c0_i32_0 = arith.constant 0 : i32
    %c0_i32_1 = arith.constant 0 : i32
    return %c0_i32, %c0_i32_0 : i32, i32
  }
  func.func @transform_7(%arg0: i32) -> (i32, i32, i32) {
    %c0_i32 = arith.constant 0 : i32
    %c0_i32_0 = arith.constant 0 : i32
    %c0_i32_1 = arith.constant 0 : i32
    return %arg0, %c0_i32, %c0_i32_0 : i32, i32, i32
  }
  func.func @transform_8(%arg0: i32) -> (i32, i32, i32) {
    %c0_i32 = arith.constant 0 : i32
    %c0_i32_0 = arith.constant 0 : i32
    %c0_i32_1 = arith.constant 0 : i32
    return %arg0, %c0_i32, %c0_i32_0 : i32, i32, i32
  }
}

</mosaic_0001>

<bundles_post_ra>
// kernel: tpu_custom_call.1
= control target key start
LH: loop header
LB: loop body
LE: loop exit
PB: predicated region body
PF: predicated region fallthrough
CT: control target
= control target key end

     0   :  { %s1925_s0 = inlined_call_operand.vmem [shape: f32[2], index: 0, kind: input, shape index: {}]   ;;  %s1926_s1 = inlined_call_operand.vmem [shape: bf16[2,16,64], index: 1, kind: input, shape index: {}]   ;;  %s1927_s2 = inlined_call_operand.vmem [shape: bf16[32,16], index: 2, kind: input, shape index: {}]   ;;  %s1928_s3 = inlined_call_operand.vmem [shape: f32[32,6], index: 3, kind: input, shape index: {}]   ;;  %s1929_s4 = inlined_call_operand.vmem [shape: bf16[3,32,32], index: 4, kind: input, shape index: {}]   ;;  %s1930_s5 = inlined_call_operand.vmem [shape: bf16[32,32], index: 5, kind: input, shape index: {}]   ;;  %s1931_s6 = inlined_call_operand.vmem [shape: f32[32,1], index: 6, kind: input, shape index: {}]   ;;  %s1932_s7 = inlined_call_operand.hbm [shape: bf16[2,16,128], index: 7, kind: output, shape index: {0}]   ;;  %s1933_s8 = inlined_call_operand.hbm [shape: bf16[2,16,128], index: 8, kind: output, shape index: {1}]  }
   0x1   :  { %1934 = sst [smem:[#allocation11_spill]] %s1925_s0 }
   0x2   :  { %14 = vsyncpa [#allocation4], 0 }
   0x3   :  { %15 = vsyncpa [#allocation3], 0 }
   0x4   :  { %17 = vsyncpa [#allocation3 + $0x1], 0 }
   0x5   :  { %18 = vsyncpa [#allocation7], 0 }
   0x6   :  { %20 = vsyncpa [#allocation7 + $0x1], 0  ;;  %s1614_s27 = smov 0   ;;  %s1616_s28 = smov 0  }
   0x7   :  { %s1618_s29 = smov 0   ;;  %s1620_s30 = smov 0  }
   0x8 LB: > { %s1635_s9 = sadd.s32 4294967295, %s1553_s30   ;;  %s1173_s10 = sadd.s32 4294967294, %s1553_s30   ;;  %s1553_s30 = sphi %s1620_s30, %s1942_s30   ;;  %s1549_s29 = sphi %s1618_s29, %s1941_s29   ;;  %s1545_s28 = sphi %s1616_s28, %s1940_s28   ;;  %s1541_s27 = sphi %s1614_s27, %s1939_s27  }
   0x9   : > { %s1639_s11 = sadd.s32 1, %s1553_s30   ;;  %s185_s12 = sadd.s32 1, %s1549_s29 }
   0xa   : > { %s182_s13 = ssub.s32 %s1553_s30, %s1639_s11  ;;  %p195_p0 = scmp.ne.s32.totalorder %s1549_s29, %s1545_s28 }
   0xb   : > { %p183_p1 = scmp.eq.s32.totalorder %s182_s13, 0  ;;  %p196_p2 = scmp.eq.s32.totalorder %s1635_s9, 1 }
   0xc   : > { %p201_p3 = scmp.ne.s32.totalorder %s1545_s28, %s1541_s27  ;;  %p202_p4 = scmp.eq.s32.totalorder %s1173_s10, 1 }
   0xd   : > { %s1650_s14 = scalar_select %p183_p1, %s1549_s29, %s185_s12  }
   0xe   : > { %p1652_p5 = por %p196_p2, %p195_p0  ;;  %p1656_p6 = por %p202_p4, %p201_p3 }
   0xf   : > { %p1174_p7 = scmp.ge.s32.totalorder %s1553_s30, 1  ;;  %p235_p8 = scmp.lt.s32.totalorder %s1553_s30, 3 }
  0x10   : > { %p1342_p9 = scmp.eq.s32.totalorder %s1635_s9, 0  ;;  %s1938_s0 = sld [smem:[#allocation11_spill]] }
  0x11   : > { %p1663_p10 = pnand %p1174_p7, %p235_p8 }
  0x13   : > { %p1331_p11 = pneg %p1663_p10 }
  0x15   : > { %p1332_p12 = pnand %p1342_p9, %p1331_p11 }
  0x16   : > { %s248_s20 = sshll.u32 %s1938_s0, 4  ;;  %s249_s20 = int_to_ptr.vmem [resolvable:$true] %s248_s20 }
  0x17   : > { %s1440_s21 = scalar_lea.vmem %s249_s20, 16  ;;  %p1442_p0 = pneg %p1332_p12 }
  0x18   : > { %p1441_p13 = scmp.ne.s32.totalorder %s249_s20, %s1440_s21  ;;  %p1448_p3 = scmp.lt.s32.totalorder %s249_s20, %s249_s20 }
  0x19   : > { %p1449_p4 = scmp.lt.s32.totalorder %s1440_s21, %s1440_s21 }
  0x1a   : > { %p1443_p1 = pnand %p1442_p0, %p1441_p13 }
  0x1b   : > { %p1450_p7 = por %p1449_p4, %p1448_p3 }
  0x1c   : > { %p1444_p2 = pneg %p1443_p1 }
  0x1e   : > { %p1451_p8 = pnand %p1450_p7, %p1444_p2 }
  0x20   : > { %1454 = shalt.err (!%p1451_p8)
}
  0x21   : > { %s1555_s22 = smov [#allocation2]   ;;  %284 = sbr.rel (%p1663_p10) target bundleno = 1488 (0x5d0), region = 48 }
  0x22   : > { %1334 = dma.vmem_to_smem (!%p1332_p12), %s249_s20, 16, %s1555_s22, [#allocation4]  }
  0x28   : > { %1528 = dma.done.wait (%p1342_p9), [#allocation4], 16  }
  0x29   : > { %1530 = vsyncadd (%p1342_p9), [#allocation4], 4294967280 }
  0x2a   : > { %290 = sfence }
  0x2b   : > { %p324_p11 = scmp.lt.s32.totalorder %s1635_s9, 1  ;;  %vm345_vm0 = vcmask 523264   ;;  %v1426_v0 = vld [vmem:[%s1927_s2] sm:$0xff]   ;;  %vm383_vm1 = vcmask 130048   ;;  %v1556_v1 = vmov 0   ;;  %v1697_v3 = vld [vmem:[%s1928_s3 + $0x10] sm:$0xff]  ;;  %v330_v9 = vlaneseq }
  0x2c   : > { %1389 = vset.pattern.permute.xlu0 %v1556_v1  ;;  %v1689_v2 = vld [vmem:[%s1928_s3] sm:$0xff]  ;;  %1390 = vset.pattern.permute.xlu1 %v1556_v1  ;;  %vm1187_vm2 = vmpackc.low %vm345_vm0, %vm345_vm0  ;;  %v1702_v4 = vld [vmem:[%s1928_s3 + $0x8] sm:$0xff]  ;;  %v1557_v8 = vmov 1   ;;  %v1558_v24 = vmov 0.0   ;;  %v1559_v48 = vmov 2   ;;  %vm581_vm8 = vcmask 261120  }
  0x2d   : > { %s325_s25 = scalar_select %p324_p11, %s1635_s9, 1  ;;  %1267 = vmatprep.mubr.msk.bf16.mxu0 %vm383_vm1, %v1426_v0  ;;  %355 = vperm.xlu0 %1389, %v1689_v2   ;;  %v1708_v5 = vld [vmem:[%s1928_s3 + $0x18] sm:$0xff]  ;;  %v1427_v7 = vld [vmem:[%s1927_s2 + $0x8] sm:$0xff]   ;;  %v331_v12 = vand.u32 127, %v330_v9 }
  0x2e   : > { %365 = vperm.xlu1 %1390, %v1697_v3   ;;  %s1560_s26 = smov 1   ;;  %s1561_s10 = smov 127  }
  0x2f   : > { %s1228_s19 = sshll.u32 %s325_s25, 3  ;;  %s335_s25 = sld [smem:[#allocation2]]  ;;  %vm332_vm3 = vcmp.lt.s32.totalorder %v331_v12, 64 }
  0x30   : > { %s328_s24 = scalar_lea.vmem %s1926_s1, %s1228_s19  ;;  %v1719_v25 = vsel %vm332_vm3, 1.0, %v1558_v24 }
  0x31   : > { %v1425_v6 = vld [vmem:[%s328_s24] sm:$0xff]   ;;  %360 = vperm.xlu0 %1389, %v1702_v4   ;;  %s1184_s24 = sld [smem:[#allocation2 + $0x1]] }
  0x32   : > { %1265 = vmatprep.subr.msk.bf16.mxu0 %vm1187_vm2, %v1425_v6  ;;  %370 = vperm.xlu1 %1390, %v1708_v5  }
  0x33   : > { %1266 = vmatpush3.bf16.msk.msra.mxu0 %vm1187_vm2, %v1425_v6 }
  0x35   : > { %1391 = vset.pattern.permute.xlu0 %v1557_v8  ;;  %v443_v14 = vstv %s335_s25 }
  0x36   : > { %1268 = vmatmul.mubr.msk.bf16.vlgmr.msra.gmra.mrb[0].mxu0 %vm383_vm1, %v1427_v7  ;;  %1392 = vset.pattern.permute.xlu1 %v1557_v8 }
  0xac   : > { %v356_v11 = vpop.permute.xlu0 %355 }
  0xad   : > { %v366_v10 = vpop.permute.xlu1 %365 }
  0xb0   : > { %v361_v20 = vpop.permute.xlu0 %360 }
  0xb1   : > { %v371_v15 = vpop.permute.xlu1 %370 }
 0x109   : > { %v1269_v13 = vpop.f32.mrb[0].mxu0 }
 0x10a   : > { %v433_v16 = vadd.f32 %v1269_v13, %v366_v10  ;;  %v424_v17 = vpop.f32.mrb[1].mxu0 }
 0x10b   : > { %v425_v18 = vadd.f32 %v424_v17, %v356_v11  ;;  %v1270_v19 = vpop.f32.mrb[2].mxu0 }
 0x10c   : > { %vm441_vm4 = vcmp.gt.f32.partialorder %v433_v16, 0.0  ;;  %v446_v21 = vmul.f32 %v443_v14, %v433_v16  ;;  %v436_v22 = vadd.f32 %v1270_v19, %v371_v15  ;;  %v427_v23 = vpop.f32.mrb[3].mxu0 }
 0x10d   : > { %vm439_vm5 = vcmp.gt.f32.partialorder %v425_v18, 0.0  ;;  %v444_v26 = vmul.f32 %v443_v14, %v425_v18  ;;  %v428_v27 = vadd.f32 %v427_v23, %v361_v20 }
 0x10e   : > { %vm442_vm6 = vcmp.gt.f32.partialorder %v436_v22, 0.0  ;;  %v447_v28 = vmul.f32 %v443_v14, %v436_v22  ;;  %v1721_v29 = vsel %vm441_vm4, %v433_v16, %v446_v21 }
 0x10f   : > { %v1723_v30 = vsel %vm439_vm5, %v425_v18, %v444_v26  ;;  %vm440_vm7 = vcmp.gt.f32.partialorder %v428_v27, 0.0  ;;  %v445_v31 = vmul.f32 %v443_v14, %v428_v27  ;;  %v454_v36 = vmul.f32 %v1719_v25, %v1721_v29 }
 0x110   : > { %v452_v32 = vmul.f32 %v1719_v25, %v1723_v30  ;;  %v1729_v34 = vsel %vm442_vm6, %v436_v22, %v447_v28 }
 0x111   : > { %v1727_v33 = vsel %vm440_vm7, %v428_v27, %v445_v31  ;;  %v455_v37 = vmul.f32 %v1719_v25, %v1729_v34  ;;  %v470_v42 = vmul.f32 %v454_v36, %v454_v36 }
 0x112   : > { %v453_v35 = vmul.f32 %v1719_v25, %v1727_v33  ;;  %v468_v39 = vmul.f32 %v452_v32, %v452_v32 }
 0x113   : > { %v471_v45 = vmul.f32 %v455_v37, %v455_v37 }
 0x114   : > { %v456_v38 = vadd.f32 %v453_v35, %v452_v32  ;;  %v469_v40 = vmul.f32 %v453_v35, %v453_v35 }
 0x116   : > { %v457_v41 = vadd.f32 %v456_v38, %v454_v36  ;;  %v472_v43 = vadd.f32 %v469_v40, %v468_v39 }
 0x118   : > { %v458_v44 = vadd.f32 %v457_v41, %v455_v37  ;;  %v473_v46 = vadd.f32 %v472_v43, %v470_v42  ;;  %v1428_v37 = vld [vmem:[%s1929_s4] sm:$0xff]   ;;  %v1430_v42 = vld [vmem:[%s1929_s4 + $0x10] sm:$0xff]   ;;  %v1431_v43 = vld [vmem:[%s1929_s4 + $0x18] sm:$0xff]  }
 0x119   : > { %1283 = vmatprep.mubr.msk.bf16.mxu1 %vm581_vm8, %v1428_v37  ;;  %1275 = vmatprep.mubr.msk.bf16.mxu0 %vm581_vm8, %v1430_v42 }
 0x11a   : > { %459 = vadd.xlane.f32.xlu0 %v458_v44  ;;  %v474_v47 = vadd.f32 %v473_v46, %v471_v45  ;;  %v1562_v44 = vmov 3  }
 0x11c   : > { %475 = vadd.xlane.f32.xlu1 %v474_v47 }
 0x12d   : > { %511 = vperm.xlu1 %1392, %v1702_v4  }
 0x130   : > { %507 = vperm.xlu0 %1391, %v1689_v2  }
 0x131   : > { %1393 = vset.pattern.permute.xlu1 %v1559_v48 }
 0x132   : > { %527 = vperm.xlu1 %1393, %v1689_v2  }
 0x134   : > { %1416 = vset.pattern.permute.xlu0 %v1562_v44 }
 0x136   : > { %531 = vperm.xlu1 %1393, %v1702_v4  }
 0x13a   : > { %1394 = vset.pattern.permute.xlu1 %v1557_v8 }
 0x13b   : > { %515 = vperm.xlu1 %1394, %v1697_v3  }
 0x13f   : > { %519 = vperm.xlu1 %1394, %v1708_v5  }
 0x143   : > { %1395 = vset.pattern.permute.xlu1 %v1559_v48 }
 0x144   : > { %535 = vperm.xlu1 %1395, %v1697_v3  }
 0x148   : > { %539 = vperm.xlu1 %1395, %v1708_v5  }
 0x14c   : > { %1417 = vset.pattern.permute.xlu1 %v1562_v44 }
 0x1a7   : > { %v460_v49 = vpop.xlane.xlu0 %459 }
 0x1a8   : > { %v461_v50 = vrot.slane %v460_v49, 4 }
 0x1a9   : > { %v476_v51 = vpop.xlane.xlu1 %475 }
 0x1aa   : > { %v462_v52 = vadd.f32 %v461_v50, %v460_v49  ;;  %v477_v53 = vrot.slane %v476_v51, 4 }
 0x1ac   : > { %v463_v54 = vrot.slane %v462_v52, 2  ;;  %v478_v55 = vadd.f32 %v477_v53, %v476_v51 }
 0x1ad   : > { %v512_v6 = vpop.permute.xlu1 %511 }
 0x1ae   : > { %v479_v56 = vrot.slane %v478_v55, 2  ;;  %v464_v57 = vadd.f32 %v463_v54, %v462_v52 }
 0x1af   : > { %v508_v18 = vpop.permute.xlu0 %507 }
 0x1b0   : > { %v465_v58 = vrot.slane %v464_v57, 1  ;;  %v480_v59 = vadd.f32 %v479_v56, %v478_v55 }
 0x1b1   : > { %v528_v7 = vpop.permute.xlu1 %527 }
 0x1b2   : > { %v466_v60 = vadd.f32 %v465_v58, %v464_v57  ;;  %v481_v61 = vrot.slane %v480_v59, 1 }
 0x1b4   : > { %1311 = vpush %v466_v60  ;;  %v482_v62 = vadd.f32 %v481_v61, %v480_v59  ;;  %v1429_v60 = vld [vmem:[%s1929_s4 + $0x8] sm:$0xff]   ;;  %v1432_v61 = vld [vmem:[%s1929_s4 + $0x20] sm:$0xff]  }
 0x1b5   : > { %v532_v8 = vpop.permute.xlu1 %531 }
 0x1b6   : > { %1313 = vpush %v482_v62 }
 0x1ba   : > { %v516_v9 = vpop.permute.xlu1 %515 }
 0x1be   : > { %v520_v10 = vpop.permute.xlu1 %519 }
 0x1c3   : > { %v536_v12 = vpop.permute.xlu1 %535 }
 0x1c7   : > { %v540_v23 = vpop.permute.xlu1 %539 }
 0x1e5   : > { %s1312_s12 = spop %1311 }
 0x1e6   : > { %s486_s13 = smul.f32 0.00048828125, %s1312_s12 }
 0x1e7   : > { %s1314_s17 = spop %1313 }
 0x1e8   : > { %s490_s18 = smul.f32 %s486_s13, %s486_s13  ;;  %v492_v11 = vstv %s486_s13 }
 0x1e9   : > { %s489_s19 = smul.f32 0.00048828125, %s1314_s17  ;;  %v494_v13 = vsub.f32 %v1727_v33, %v492_v11  ;;  %v495_v14 = vsub.f32 %v1721_v29, %v492_v11  ;;  %v493_v15 = vsub.f32 %v1723_v30, %v492_v11  ;;  %v496_v16 = vsub.f32 %v1729_v34, %v492_v11 }
 0x1eb   : > { %s491_s20 = ssub.f32 %s489_s19, %s490_s18  ;;  %s1832_s19 = sand.u32 1, %s1545_s28  }
 0x1ec   : > { %s1038_s18 = scalar_lea.sflag [#allocation7], %s1832_s19 }
 0x1ed   : > { %s497_s21 = sadd.f32 1e-08, %s491_s20  ;;  %s1179_s20 = sshll.u32 %s1832_s19, 3 }
 0x1ef   : > { %v498_v63 = vstv %s497_s21  ;;  %s323_s21 = scalar_lea.vmem [#allocation6], %s1179_s20 }
 0x1f0   : > { %1436 = vrsqrt.f32 %v498_v63  ;;  %v1433_v63 = vld [vmem:[%s1929_s4 + $0x28] sm:$0xff]  }
 0x1fa   : > { %v1437_v0 = vpop.eup %1436 }
 0x1fb   : > { %1315 = vpush %v1437_v0 }
 0x22c   : > { %s1316_s22 = spop %1315 }
 0x22d   : > { %v501_v17 = vstv %s1316_s22 }
 0x22e   : > { %v503_v19 = vmul.f32 %v501_v17, %v494_v13  ;;  %v504_v20 = vmul.f32 %v501_v17, %v495_v14  ;;  %v502_v21 = vmul.f32 %v501_v17, %v493_v15  ;;  %v505_v22 = vmul.f32 %v501_v17, %v496_v16 }
 0x22f   : > { %v810_v17 = vstv %s1184_s24 }
 0x230   : > { %v523_v24 = vmul.f32 %v512_v6, %v503_v19  ;;  %v524_v26 = vmul.f32 %v516_v9, %v504_v20  ;;  %v522_v27 = vmul.f32 %v508_v18, %v502_v21  ;;  %v525_v28 = vmul.f32 %v520_v10, %v505_v22 }
 0x231   : > { %v1563_v9 = vmov 4  }
 0x232   : > { %v543_v31 = vadd.f32 %v532_v8, %v523_v24  ;;  %v544_v32 = vadd.f32 %v536_v12, %v524_v26  ;;  %v542_v33 = vadd.f32 %v528_v7, %v522_v27  ;;  %v545_v35 = vadd.f32 %v540_v23, %v525_v28 }
 0x234   : > { %v548_v29 = vmul.f32 %v1719_v25, %v544_v32  ;;  %v546_v30 = vmul.f32 %v1719_v25, %v542_v33  ;;  %v549_v34 = vmul.f32 %v1719_v25, %v545_v35  ;;  %v547_v36 = vmul.f32 %v1719_v25, %v543_v31 }
 0x236   : > { %v1401_v38 = vpack.i.bf16 %v549_v34, %v548_v29  ;;  %v1396_v39 = vpack.i.bf16 %v547_v36, %v546_v30  ;;  %v569_v40 = vpack.c.bf16 %v547_v36, %v546_v30  ;;  %v570_v41 = vpack.c.bf16 %v549_v34, %v548_v29 }
 0x238   : > { %1402 = vrot.lane.b32.xlu1 %v1401_v38, %s1560_s26  ;;  %1397 = vrot.lane.b32.xlu0 %v1396_v39, %s1560_s26 }
 0x239   : > { %1271 = vmatprep.subr.bf16.mxu0 %v569_v40 }
 0x23a   : > { %1272 = vmatpush3.bf16.msra.mxu0 %v569_v40 }
 0x23b   : > { %1273 = vmatprep.subr.bf16.mxu0 %v570_v41 }
 0x23c   : > { %1412 = vrot.lane.b32.xlu1 %v1401_v38, %s1561_s10  ;;  %1407 = vrot.lane.b32.xlu0 %v1396_v39, %s1561_s10 }
 0x23e   : > { %1274 = vmatpush3.bf16.msra.mxu0 %v570_v41 }
 0x240   : > { %791 = vperm.xlu1 %1417, %v1702_v4   ;;  %787 = vperm.xlu0 %1416, %v1689_v2  }
 0x241   : > { %1276 = vmatmul.mubr.msk.bf16.vlgmr.msra.gmra.mrb[4].mxu0 %vm581_vm8, %v1431_v43 }
 0x244   : > { %795 = vperm.xlu1 %1417, %v1697_v3   ;;  %799 = vperm.xlu0 %1416, %v1708_v5  }
 0x248   : > { %1419 = vset.pattern.permute.xlu1 %v1563_v9  ;;  %1418 = vset.pattern.permute.xlu0 %v1563_v9 }
 0x2aa   : > { %v1403_v45 = vpop.permute.xlu1 %1402  ;;  %v1398_v46 = vpop.permute.xlu0 %1397 }
 0x2ab   : > { %v1405_v47 = vunpack.i.h.bf16 %v1403_v45  ;;  %v1404_v48 = vunpack.i.l.bf16 %v1403_v45  ;;  %v1400_v49 = vunpack.i.h.bf16 %v1398_v46  ;;  %v1399_v50 = vunpack.i.l.bf16 %v1398_v46 }
 0x2ad   : > { %v562_v51 = vpack.c.bf16 %v1400_v49, %v1399_v50  ;;  %v563_v53 = vpack.c.bf16 %v1405_v47, %v1404_v48  ;;  %v1564_v50 = vmov 5  }
 0x2ae   : > { %v1408_v52 = vpop.permute.xlu0 %1407  ;;  %v1413_v56 = vpop.permute.xlu1 %1412 }
 0x2af   : > { %v1410_v54 = vunpack.i.h.bf16 %v1408_v52  ;;  %v1409_v55 = vunpack.i.l.bf16 %v1408_v52  ;;  %1279 = vmatprep.subr.bf16.mxu1 %v562_v51  ;;  %v1415_v57 = vunpack.i.h.bf16 %v1413_v56  ;;  %v1414_v58 = vunpack.i.l.bf16 %v1413_v56 }
 0x2b0   : > { %1280 = vmatpush3.bf16.msra.mxu1 %v562_v51 }
 0x2b1   : > { %1281 = vmatprep.subr.bf16.mxu1 %v563_v53  ;;  %v715_v59 = vpack.c.bf16 %v1410_v54, %v1409_v55  ;;  %v716_v62 = vpack.c.bf16 %v1415_v57, %v1414_v58 }
 0x2b4   : > { %1282 = vmatpush3.bf16.msra.mxu1 %v563_v53 }
 0x2b5   : > { %1287 = vmatprep.subr.bf16.mxu1 %v715_v59 }
 0x2b7   : > { %1284 = vmatmul.mubr.msk.bf16.vlgmr.msra.gmra.mrb[0].mxu1 %vm581_vm8, %v1429_v60 }
 0x2b8   : > { %1288 = vmatpush3.bf16.msra.mxu1 %v715_v59  ;;  %1291 = vmatprep.mubr.msk.bf16.mxu1 %vm581_vm8, %v1432_v61 }
 0x2b9   : > { %1289 = vmatprep.subr.bf16.mxu1 %v716_v62 }
 0x2bc   : > { %1290 = vmatpush3.bf16.msra.mxu1 %v716_v62 }
 0x2bf   : > { %v792_v10 = vpop.permute.xlu1 %791  ;;  %v788_v11 = vpop.permute.xlu0 %787 }
 0x2c3   : > { %1292 = vmatmul.mubr.msk.bf16.vlgmr.msra.gmra.mrb[0].mxu1 %vm581_vm8, %v1433_v63  ;;  %v796_v13 = vpop.permute.xlu1 %795  ;;  %v800_v19 = vpop.permute.xlu0 %799  ;;  %v922_v63 = vld [vmem:[%s1931_s6 + $0x18] sm:$0xff] }
 0x314   : > { %v1277_v0 = vpop.f32.mrb[4].mxu0 }
 0x315   : > { %v622_v6 = vpop.f32.mrb[5].mxu0 }
 0x316   : > { %v1278_v7 = vpop.f32.mrb[6].mxu0 }
 0x317   : > { %v625_v8 = vpop.f32.mrb[7].mxu0 }
 0x396   : > { %v1293_v12 = vpop.f32.mrb[0].mxu1 }
 0x397   : > { %v1303_v14 = vadd.f32 %v1293_v12, %v1277_v0  ;;  %v767_v15 = vpop.f32.mrb[1].mxu1  ;;  %v921_v0 = vld [vmem:[%s1931_s6 + $0x10] sm:$0xff] }
 0x398   : > { %v1304_v16 = vadd.f32 %v767_v15, %v622_v6  ;;  %v1294_v18 = vpop.f32.mrb[2].mxu1 }
 0x399   : > { %v804_v20 = vadd.f32 %v1303_v14, %v796_v13  ;;  %v1305_v21 = vadd.f32 %v1294_v18, %v1278_v7  ;;  %v770_v22 = vpop.f32.mrb[3].mxu1 }
 0x39a   : > { %v802_v23 = vadd.f32 %v1304_v16, %v788_v11  ;;  %v1306_v24 = vadd.f32 %v770_v22, %v625_v8 }
 0x39b   : > { %vm808_vm9 = vcmp.gt.f32.partialorder %v804_v20, 0.0  ;;  %v813_v26 = vmul.f32 %v810_v17, %v804_v20  ;;  %v805_v27 = vadd.f32 %v1305_v21, %v800_v19 }
 0x39c   : > { %vm806_vm10 = vcmp.gt.f32.partialorder %v802_v23, 0.0  ;;  %v811_v28 = vmul.f32 %v810_v17, %v802_v23  ;;  %v803_v31 = vadd.f32 %v1306_v24, %v792_v10 }
 0x39d   : > { %vm809_vm11 = vcmp.gt.f32.partialorder %v805_v27, 0.0  ;;  %v814_v32 = vmul.f32 %v810_v17, %v805_v27  ;;  %v1783_v35 = vsel %vm808_vm9, %v804_v20, %v813_v26 }
 0x39e   : > { %v1781_v33 = vsel %vm806_vm10, %v802_v23, %v811_v28  ;;  %vm807_vm12 = vcmp.gt.f32.partialorder %v803_v31, 0.0  ;;  %v812_v29 = vmul.f32 %v810_v17, %v803_v31  ;;  %v821_v38 = vmul.f32 %v1719_v25, %v1783_v35 }
 0x39f   : > { %v819_v30 = vmul.f32 %v1719_v25, %v1781_v33  ;;  %v1789_v36 = vsel %vm809_vm11, %v805_v27, %v814_v32 }
 0x3a0   : > { %v1787_v34 = vsel %vm807_vm12, %v803_v31, %v812_v29  ;;  %v822_v39 = vmul.f32 %v1719_v25, %v1789_v36  ;;  %v837_v44 = vmul.f32 %v821_v38, %v821_v38 }
 0x3a1   : > { %v820_v37 = vmul.f32 %v1719_v25, %v1787_v34  ;;  %v835_v41 = vmul.f32 %v819_v30, %v819_v30 }
 0x3a2   : > { %v838_v47 = vmul.f32 %v822_v39, %v822_v39 }
 0x3a3   : > { %v823_v40 = vadd.f32 %v820_v37, %v819_v30  ;;  %v836_v42 = vmul.f32 %v820_v37, %v820_v37 }
 0x3a5   : > { %v824_v43 = vadd.f32 %v823_v40, %v821_v38  ;;  %v839_v45 = vadd.f32 %v836_v42, %v835_v41 }
 0x3a7   : > { %v825_v46 = vadd.f32 %v824_v43, %v822_v39  ;;  %v840_v48 = vadd.f32 %v839_v45, %v837_v44 }
 0x3a9   : > { %826 = vadd.xlane.f32.xlu1 %v825_v46  ;;  %v841_v49 = vadd.f32 %v840_v48, %v838_v47 }
 0x3ab   : > { %842 = vadd.xlane.f32.xlu0 %v841_v49 }
 0x3ba   : > { %878 = vperm.xlu1 %1419, %v1702_v4  }
 0x3be   : > { %1420 = vset.pattern.permute.xlu1 %v1564_v50 }
 0x3bf   : > { %894 = vperm.xlu1 %1420, %v1689_v2  }
 0x3c1   : > { %874 = vperm.xlu0 %1418, %v1689_v2  }
 0x3c3   : > { %898 = vperm.xlu1 %1420, %v1702_v4  }
 0x3c5   : > { %1423 = vset.pattern.permute.xlu0 %v1556_v1 }
 0x3c7   : > { %1421 = vset.pattern.permute.xlu1 %v1563_v9 }
 0x3c8   : > { %882 = vperm.xlu1 %1421, %v1697_v3  }
 0x3cc   : > { %886 = vperm.xlu1 %1421, %v1708_v5  }
 0x3d0   : > { %1422 = vset.pattern.permute.xlu1 %v1564_v50 }
 0x3d1   : > { %902 = vperm.xlu1 %1422, %v1697_v3   ;;  %v919_v3 = vld [vmem:[%s1931_s6] sm:$0xff] }
 0x3d2   : > { %925 = vperm.xlu0 %1423, %v919_v3  }
 0x3d5   : > { %906 = vperm.xlu1 %1422, %v1708_v5   ;;  %v920_v5 = vld [vmem:[%s1931_s6 + $0x8] sm:$0xff] }
 0x3d6   : > { %940 = vperm.xlu0 %1423, %v922_v63  }
 0x3d9   : > { %1424 = vset.pattern.permute.xlu1 %v1556_v1  ;;  %v1434_v1 = vld [vmem:[%s1930_s5] sm:$0xff]  }
 0x3da   : > { %1299 = vmatprep.mubr.msk.bf16.mxu0 %vm581_vm8, %v1434_v1  ;;  %930 = vperm.xlu1 %1424, %v920_v5  }
 0x3de   : > { %935 = vperm.xlu1 %1424, %v921_v0  }
 0x436   : > { %v827_v51 = vpop.xlane.xlu1 %826 }
 0x437   : > { %v828_v52 = vrot.slane %v827_v51, 4 }
 0x438   : > { %v843_v53 = vpop.xlane.xlu0 %842 }
 0x439   : > { %v829_v2 = vadd.f32 %v828_v52, %v827_v51  ;;  %v844_v54 = vrot.slane %v843_v53, 4 }
 0x43a   : > { %v879_v8 = vpop.permute.xlu1 %878 }
 0x43b   : > { %v830_v4 = vrot.slane %v829_v2, 2  ;;  %v845_v55 = vadd.f32 %v844_v54, %v843_v53 }
 0x43d   : > { %v846_v56 = vrot.slane %v845_v55, 2  ;;  %v831_v57 = vadd.f32 %v830_v4, %v829_v2 }
 0x43e   : > { %v895_v9 = vpop.permute.xlu1 %894 }
 0x43f   : > { %v832_v58 = vrot.slane %v831_v57, 1  ;;  %v847_v59 = vadd.f32 %v846_v56, %v845_v55 }
 0x440   : > { %v875_v20 = vpop.permute.xlu0 %874 }
 0x441   : > { %v833_v60 = vadd.f32 %v832_v58, %v831_v57  ;;  %v848_v61 = vrot.slane %v847_v59, 1 }
 0x442   : > { %v899_v10 = vpop.permute.xlu1 %898 }
 0x443   : > { %1317 = vpush %v833_v60  ;;  %v849_v62 = vadd.f32 %v848_v61, %v847_v59 }
 0x445   : > { %1319 = vpush %v849_v62 }
 0x447   : > { %v883_v11 = vpop.permute.xlu1 %882 }
 0x44b   : > { %v887_v12 = vpop.permute.xlu1 %886 }
 0x450   : > { %v903_v14 = vpop.permute.xlu1 %902 }
 0x451   : > { %v926_v39 = vpop.permute.xlu0 %925 }
 0x454   : > { %v907_v26 = vpop.permute.xlu1 %906 }
 0x455   : > { %v941_v44 = vpop.permute.xlu0 %940 }
 0x459   : > { %v931_v38 = vpop.permute.xlu1 %930 }
 0x45d   : > { %v936_v40 = vpop.permute.xlu1 %935 }
 0x474   : > { %s1318_s22 = spop %1317 }
 0x475   : > { %s853_s23 = smul.f32 0.00048828125, %s1318_s22  ;;  %s1067_s22 = sshll.u32 %s323_s21, 4  ;;  %s1845_s22 = int_to_ptr.vmem [resolvable:$true] %s1067_s22 }
 0x476   : > { %s1320_s24 = spop %1319 }
 0x477   : > { %s857_s26 = smul.f32 %s853_s23, %s853_s23  ;;  %v859_v13 = vstv %s853_s23  ;;  %s316_s23 = scalar_lea.vmem [#allocation5], %s1179_s20 }
 0x478   : > { %s856_s10 = smul.f32 0.00048828125, %s1320_s24  ;;  %v861_v15 = vsub.f32 %v1787_v34, %v859_v13  ;;  %v862_v16 = vsub.f32 %v1783_v35, %v859_v13  ;;  %v863_v17 = vsub.f32 %v1789_v36, %v859_v13  ;;  %v860_v18 = vsub.f32 %v1781_v33, %v859_v13  ;;  %v1435_v33 = vld [vmem:[%s1930_s5 + $0x8] sm:$0xff]   ;;  %s1051_s24 = sshll.u32 %s316_s23, 4  ;;  %s1852_s24 = int_to_ptr.vmem [resolvable:$true] %s1051_s24 }
 0x479   : > { %s1455_s20 = scalar_lea.vmem %s1845_s22, 128 }
 0x47a   : > { %s858_s25 = ssub.f32 %s856_s10, %s857_s26  ;;  %s1234_s26 = sshll.u32 %s1635_s9, 7 }
 0x47b   : > { %s1850_s17 = scalar_lea.hbm %s1932_s7, %s1234_s26  ;;  %p1456_p9 = scmp.ne.s32.totalorder %s1845_s22, %s1455_s20 }
 0x47c   : > { %s864_s12 = sadd.f32 1e-08, %s858_s25  ;;  %s1565_s10 = smov [#allocation6]  }
 0x47d   : > { %p1457_p10 = pnand %p1456_p9, %p1652_p5  ;;  %s1459_s25 = sshll.u32 %s1565_s10, 4  ;;  %s1460_s25 = int_to_ptr.vmem [resolvable:$false] %s1459_s25 }
 0x47e   : > { %v865_v6 = vstv %s864_s12  ;;  %s1843_s12 = scalar_lea.hbm %s1933_s8, %s1234_s26  ;;  %s1461_s0 = scalar_lea.vmem %s1460_s25, 256 }
 0x47f   : > { %1438 = vrsqrt.f32 %v865_v6  ;;  %p1458_p12 = pneg %p1457_p10  ;;  %p1462_p13 = scmp.lt.s32.totalorder %s1845_s22, %s1460_s25 }
 0x480   : > { %p1463_p0 = scmp.lt.s32.totalorder %s1461_s0, %s1455_s20 }
 0x482   : > { %p1464_p1 = por %p1463_p0, %p1462_p13 }
 0x484   : > { %p1465_p2 = pnand %p1464_p1, %p1458_p12 }
 0x489   : > { %v1439_v7 = vpop.eup %1438 }
 0x48a   : > { %1321 = vpush %v1439_v7 }
 0x4bb   : > { %s1322_s13 = spop %1321 }
 0x4bc   : > { %v868_v19 = vstv %s1322_s13 }
 0x4bd   : > { %v870_v21 = vmul.f32 %v868_v19, %v861_v15  ;;  %v871_v22 = vmul.f32 %v868_v19, %v862_v16  ;;  %v872_v23 = vmul.f32 %v868_v19, %v863_v17  ;;  %v869_v24 = vmul.f32 %v868_v19, %v860_v18 }
 0x4bf   : > { %v890_v27 = vmul.f32 %v879_v8, %v870_v21  ;;  %v891_v28 = vmul.f32 %v883_v11, %v871_v22  ;;  %v889_v31 = vmul.f32 %v875_v20, %v869_v24  ;;  %v892_v32 = vmul.f32 %v887_v12, %v872_v23 }
 0x4c1   : > { %v911_v29 = vadd.f32 %v903_v14, %v891_v28  ;;  %v909_v30 = vadd.f32 %v895_v9, %v889_v31  ;;  %v912_v35 = vadd.f32 %v907_v26, %v892_v32  ;;  %v910_v34 = vadd.f32 %v899_v10, %v890_v27 }
 0x4c3   : > { %v917_v36 = vpack.c.bf16 %v910_v34, %v909_v30  ;;  %v918_v37 = vpack.c.bf16 %v912_v35, %v911_v29 }
 0x4c5   : > { %1295 = vmatprep.subr.bf16.mxu0 %v917_v36 }
 0x4c6   : > { %1296 = vmatpush3.bf16.msra.mxu0 %v917_v36 }
 0x4c7   : > { %1297 = vmatprep.subr.bf16.mxu0 %v918_v37 }
 0x4ca   : > { %1298 = vmatpush3.bf16.msra.mxu0 %v918_v37 }
 0x4cd   : > { %1300 = vmatmul.mubr.msk.bf16.vlgmr.msra.gmra.mrb[8].mxu0 %vm581_vm8, %v1435_v33 }
 0x5a0   : > { %v1301_v41 = vpop.f32.mrb[8].mxu0 }
 0x5a1   : > { %v1002_v42 = vadd.f32 %v1301_v41, %v936_v40  ;;  %v993_v43 = vpop.f32.mrb[9].mxu0 }
 0x5a2   : > { %v994_v45 = vadd.f32 %v993_v43, %v926_v39  ;;  %v1302_v46 = vpop.f32.mrb[10].mxu0 }
 0x5a3   : > { %v1005_v47 = vadd.f32 %v1302_v46, %v941_v44  ;;  %v996_v48 = vpop.f32.mrb[11].mxu0  ;;  %v1010_v50 = vmul.f32 %v1719_v25, %v1002_v42 }
 0x5a4   : > { %v997_v49 = vadd.f32 %v996_v48, %v931_v38  ;;  %v1008_v52 = vmul.f32 %v1719_v25, %v994_v45 }
 0x5a5   : > { %v1011_v51 = vmul.f32 %v1719_v25, %v1005_v47 }
 0x5a6   : > { %v1009_v53 = vmul.f32 %v1719_v25, %v997_v49 }
 0x5a7   : > { %v1244_v2 = vpack.c.bf16 %v1011_v51, %v1010_v50 }
 0x5a8   : > { %v1239_v54 = vpack.c.bf16 %v1009_v53, %v1008_v52 }
 0x5a9   : > { %1245 = vst [vmem:[%s323_s21] sm:$0xff] %v1244_v2  }
 0x5aa   : > { %1240 = vst [vmem:[%s316_s23] sm:$0xff] %v1239_v54  }
 0x5ab   : > { %1468 = shalt.err (!%p1465_p2)
}
 0x5ac   : > { %s1469_s21 = scalar_lea.hbm %s1843_s12, 128  ;;  %s1473_s9 = scalar_lea.hbm %s1933_s8, 256 }
 0x5ad   : > { %p1470_p3 = scmp.ne.s32.totalorder %s1843_s12, %s1469_s21  ;;  %p1474_p8 = scmp.lt.u32.totalorder %s1843_s12, %s1933_s8 }
 0x5ae   : > { %p1475_p11 = scmp.lt.u32.totalorder %s1473_s9, %s1469_s21  ;;  %p1477_p10 = scmp.lt.u32.totalorder %s1469_s21, %s1843_s12 }
 0x5af   : > { %p1471_p4 = pnand %p1470_p3, %p1652_p5 }
 0x5b0   : > { %p1476_p9 = por %p1475_p11, %p1474_p8 }
 0x5b1   : > { %p1472_p7 = pneg %p1471_p4 }
 0x5b2   : > { %p1478_p12 = por %p1477_p10, %p1476_p9 }
 0x5b4   : > { %p1479_p13 = pnand %p1478_p12, %p1472_p7 }
 0x5b6   : > { %1482 = shalt.err (!%p1479_p13)
}
 0x5b7   : > { %s1566_s0 = smov 64   ;;  %s1567_s20 = smov 4  }
 0x5b8   : > { %1328 = dma.vmem_to_hbm [thread:$0]  (%p1652_p5), %s1845_s22, 128, %s1843_s12, %s1038_s18, %s1566_s0, %s1566_s0, %s1567_s20  }
 0x5b9   : > { %s1033_s25 = scalar_lea.sflag [#allocation3], %s1832_s19  ;;  %s1483_s21 = scalar_lea.vmem %s1852_s24, 128 }
 0x5ba   : > { %p1484_p0 = scmp.ne.s32.totalorder %s1852_s24, %s1483_s21  ;;  %s1568_s23 = smov [#allocation5]  }
 0x5bb   : > { %s1487_s26 = sshll.u32 %s1568_s23, 4  ;;  %s1488_s26 = int_to_ptr.vmem [resolvable:$false] %s1487_s26 }
 0x5bc   : > { %p1485_p1 = pnand %p1484_p0, %p1652_p5  ;;  %s1489_s9 = scalar_lea.vmem %s1488_s26, 256 }
 0x5bd   : > { %p1490_p3 = scmp.lt.s32.totalorder %s1852_s24, %s1488_s26  ;;  %p1491_p4 = scmp.lt.s32.totalorder %s1489_s9, %s1483_s21 }
 0x5be   : > { %p1486_p2 = pneg %p1485_p1 }
 0x5bf   : > { %p1492_p7 = por %p1491_p4, %p1490_p3 }
 0x5c1   : > { %p1493_p8 = pnand %p1492_p7, %p1486_p2 }
 0x5c3   : > { %1496 = shalt.err (!%p1493_p8)
}
 0x5c4   : > { %s1497_s22 = scalar_lea.hbm %s1850_s17, 128  ;;  %s1501_s13 = scalar_lea.hbm %s1932_s7, 256 }
 0x5c5   : > { %p1498_p11 = scmp.ne.s32.totalorder %s1850_s17, %s1497_s22  ;;  %p1502_p12 = scmp.lt.u32.totalorder %s1850_s17, %s1932_s7 }
 0x5c6   : > { %p1503_p13 = scmp.lt.u32.totalorder %s1501_s13, %s1497_s22  ;;  %p1505_p1 = scmp.lt.u32.totalorder %s1497_s22, %s1850_s17 }
 0x5c7   : > { %p1499_p9 = pnand %p1498_p11, %p1652_p5 }
 0x5c8   : > { %p1504_p0 = por %p1503_p13, %p1502_p12 }
 0x5c9   : > { %p1500_p10 = pneg %p1499_p9 }
 0x5ca   : > { %p1506_p2 = por %p1505_p1, %p1504_p0 }
 0x5cc   : > { %p1507_p3 = pnand %p1506_p2, %p1500_p10 }
 0x5ce   : > { %1510 = shalt.err (!%p1507_p3)
}
 0x5cf   : > { %1327 = dma.vmem_to_hbm [thread:$0]  (%p1652_p5), %s1852_s24, 128, %s1850_s17, %s1033_s25, %s1566_s0, %s1566_s0, %s1567_s20  }
 0x5d0 PF: > { %p1344_p4 = scmp.ge.s32.totalorder %s1553_s30, 2  ;;  %s1082_s21 = sand.u32 1, %s1541_s27  }
 0x5d1   : > { %s1083_s26 = scalar_lea.sflag [#allocation3], %s1082_s21 }
 0x5d2   : > { %p1336_p7 = pnand %p1344_p4, %p1656_p6 }
 0x5d4   : > { %1532 = dma.done.wait (!%p1336_p7), %s1083_s26, 128  }
 0x5d5   : > { %1534 = vsyncadd (!%p1336_p7), %s1083_s26, 4294967168  ;;  %s1092_s15 = scalar_lea.sflag [#allocation7], %s1082_s21 }
 0x5d6   : > { %1536 = dma.done.wait (!%p1336_p7), %s1092_s15, 128  }
 0x5d7   : > { %1538 = vsyncadd (!%p1336_p7), %s1092_s15, 4294967168  ;;  %p23_p5 = scmp.ge.s32.totalorder %s1639_s11, 4   ;;  %s1939_s27 = smov %s1545_s28 }
 0x5d8   : > { %s1940_s28 = smov %s1549_s29  ;;  %s1941_s29 = smov %s1650_s14 }
 0x5d9   : > { %s1942_s30 = smov %s1639_s11  ;;  %25 = sbr.rel (!%p23_p5) target bundleno = 8 (0x8), region = 107 }
 0x5e0   :  { %1097 = vsyncpa [#allocation3], 1 }
 0x5e1   :  { %1099 = vsyncpa [#allocation3 + $0x1], 1 }
 0x5e2   :  { %1100 = vsyncpa [#allocation7], 1 }
 0x5e3   :  { %1102 = vsyncpa [#allocation7 + $0x1], 1 }
 0x5e4   :  { %1103 = vsyncpa [#allocation4], 1 }
 0x5e5   :  { %1105 = vsyncpa [#allocation4 + $0x1], 1 }

</bundles_post_ra>
